<compile_context>
chip_gen: v7x
topology: tpu7x:2x2x1
jax: 0.10.0
libtpu: 0.0.40
codegen_flags: <defaults>
</compile_context>

<pallas_src>
import jax
import jax.numpy as jnp
from jax.experimental import pallas as pl
from jax.experimental.pallas import tpu as pltpu


def _concat_last_dim_kernel(a_ref, b_ref, o_ref):
    # a_ref: [tm, D1]       (VMEM)
    # b_ref: [tm, D2]       (VMEM)
    # o_ref: [tm, D1 + D2]  (VMEM)
    d1 = a_ref.shape[-1]
    o_ref[:, :d1] = a_ref[...]
    o_ref[:, d1:] = b_ref[...]


def _round_up(x, m):
    return ((x + m - 1) // m) * m


def stem_output_concatenation(
    internal_enc,
    external_enc,
    *,
    min_pallas_bytes=128 * 1024,       # below this, XLA's concat wins (launch overhead)
    tile_traffic_bytes=8 * 1024 * 1024,  # target HBM bytes moved per grid step
    vmem_limit_bytes=32 * 1024 * 1024,   # safe on v5e/v6e/v7x, > double-buffered tile
):
    """Pallas equivalent of StemOutputConcatenation.forward.

    Args:
      internal_enc: [..., D1]
      external_enc: [..., D2]  (same leading dims and dtype as internal_enc)

    Returns:
      [..., D1 + D2] — concatenation along the last dim (same dtype).
    """
    assert internal_enc.shape[:-1] == external_enc.shape[:-1], "leading dims must match"
    assert internal_enc.dtype == external_enc.dtype, "dtypes must match"

    lead = internal_enc.shape[:-1]
    d1 = internal_enc.shape[-1]
    d2 = external_enc.shape[-1]
    d_out = d1 + d2

    rows = 1
    for s in lead:
        rows *= s

    itemsize = jnp.dtype(internal_enc.dtype).itemsize
    out_bytes = rows * d_out * itemsize

    # Bailout: tiny tensors are pure fixed overhead for a kernel launch, and
    # d_out < 128 means every output store is a masked partial (lane-sparse)
    # store — let XLA's native concatenate handle both cases.
    if rows == 0 or out_bytes < min_pallas_bytes or d_out < 128:
        return jnp.concatenate([internal_enc, external_enc], axis=-1)

    a2 = internal_enc.reshape(rows, d1)
    b2 = external_enc.reshape(rows, d2)

    # Sublane packing multiple for the dtype (8 f32 / 16 bf16 / 32 int8).
    sublane = max(8, 32 // itemsize)

    # Adaptive row tile: per-row HBM traffic = (d1 + d2 + d_out) * itemsize
    # = 2 * d_out * itemsize. Target ~tile_traffic_bytes per grid step, so the
    # double-buffered VMEM working set is ~2 * tile_traffic_bytes (< limit).
    per_row_traffic = 2 * d_out * itemsize
    tm = max(sublane, tile_traffic_bytes // per_row_traffic)
    tm = _round_up(min(tm, rows), sublane)

    # v7x megacore: if a single tile would cover all rows but there's enough
    # work to care about, split into (at least) 2 balanced steps so the
    # "parallel" grid axis can shard across both TensorCores.
    if tm >= rows and rows > 2 * sublane and 2 * out_bytes > (2 << 20):
        tm = _round_up(pl.cdiv(rows, 2), sublane)

    grid = (pl.cdiv(rows, tm),)

    bytes_accessed = 2 * out_bytes  # read both inputs + write output

    out2 = pl.pallas_call(
        _concat_last_dim_kernel,
        out_shape=jax.ShapeDtypeStruct((rows, d_out), internal_enc.dtype),
        grid_spec=pl.GridSpec(
            grid=grid,
            in_specs=[
                pl.BlockSpec((tm, d1), lambda i: (i, 0)),
                pl.BlockSpec((tm, d2), lambda i: (i, 0)),
            ],
            out_specs=pl.BlockSpec((tm, d_out), lambda i: (i, 0)),
        ),
        compiler_params=pltpu.CompilerParams(
            dimension_semantics=("parallel",),
            vmem_limit_bytes=vmem_limit_bytes,
        ),
        cost_estimate=pl.CostEstimate(
            flops=0,
            transcendentals=0,
            bytes_accessed=bytes_accessed,
        ),
    )(a2, b2)

    return out2.reshape(*lead, d_out) if lead else out2.reshape(d_out)


def _check(internal, external):
    out = jax.block_until_ready(stem_output_concatenation(internal, external))
    ref = jnp.concatenate([internal, external], axis=-1)
    assert out.shape == ref.shape, (out.shape, ref.shape)
    assert out.dtype == ref.dtype
    assert jnp.array_equal(out, ref), "mismatch vs jnp.concatenate reference"


if __name__ == "__main__":
    key = jax.random.PRNGKey(0)
    k1, k2, k3, k4, k5, k6, k7, k8 = jax.random.split(key, 8)

    # 1) Small module-consistent shape (Batch=2, Seq=8, D_int=32, D_ext=32).
    #    Takes the jnp.concatenate bailout path (4 KiB output, lane-sparse d_out).
    _check(
        jax.random.normal(k1, (2, 8, 32), dtype=jnp.float32),
        jax.random.normal(k2, (2, 8, 32), dtype=jnp.float32),
    )

    # 2) Larger, lane-aligned shape — exercises the Pallas path with fully
    #    unmasked output stores (d1 = 128 is a lane multiple).
    _check(
        jax.random.normal(k3, (4, 64, 128), dtype=jnp.float32),
        jax.random.normal(k4, (4, 64, 128), dtype=jnp.float32),
    )

    # 3) Unaligned d1 (96) — exercises the boundary-masked store path.
    _check(
        jax.random.normal(k5, (4, 128, 96), dtype=jnp.float32),
        jax.random.normal(k6, (4, 128, 160), dtype=jnp.float32),
    )

    # 4) Wide shape — exercises the adaptive multi-step pipelined grid.
    _check(
        jax.random.normal(k7, (2, 1024, 1024), dtype=jnp.float32),
        jax.random.normal(k8, (2, 1024, 1024), dtype=jnp.float32),
    )

    print("KERNEL_OK")
</pallas_src>

<mosaic_0001>
module attributes {stable_mosaic.version = 11 : i64} {
  func.func @_concat_last_dim_kernel(%arg0: i32, %arg1: memref<256x128xf32, #tpu.memory_space<vmem>>, %arg2: memref<256x128xf32, #tpu.memory_space<vmem>>, %arg3: memref<256x256xf32, #tpu.memory_space<vmem>>) attributes {dimension_semantics = [#tpu.dimension_semantics<parallel>], iteration_bounds = array<i64: 1>, scalar_prefetch = 0 : i64, scratch_operands = 0 : i64, tpu.core_type = #tpu.core_type<tc>, window_params = [{transform_indices = @transform_0, window_bounds = array<i64: 256, 128>}, {transform_indices = @transform_1, window_bounds = array<i64: 256, 128>}, {transform_indices = @transform_2, window_bounds = array<i64: 256, 256>}]} {
    %c0 = arith.constant 0 : index
    %c0_0 = arith.constant 0 : index
    %0 = vector.load %arg1[%c0, %c0_0] : memref<256x128xf32, #tpu.memory_space<vmem>>, vector<256x128xf32>
    %c0_1 = arith.constant 0 : index
    %c0_2 = arith.constant 0 : index
    %1 = vector.load %arg3[%c0_1, %c0_2] : memref<256x256xf32, #tpu.memory_space<vmem>>, vector<256x128xf32>
    tpu.vector_store %arg3[%c0_1, %c0_2], %0 {strides = array<i32>} : memref<256x256xf32, #tpu.memory_space<vmem>>, vector<256x128xf32>,
    %c0_3 = arith.constant 0 : index
    %c0_4 = arith.constant 0 : index
    %2 = vector.load %arg2[%c0_3, %c0_4] : memref<256x128xf32, #tpu.memory_space<vmem>>, vector<256x128xf32>
    %c0_5 = arith.constant 0 : index
    %c128 = arith.constant 128 : index
    %3 = vector.load %arg3[%c0_5, %c128] : memref<256x256xf32, #tpu.memory_space<vmem>>, vector<256x128xf32>
    tpu.vector_store %arg3[%c0_5, %c128], %2 {strides = array<i32>} : memref<256x256xf32, #tpu.memory_space<vmem>>, vector<256x128xf32>,
    return
  }
  func.func @transform_0(%arg0: i32) -> (i32, i32) {
    %c0_i32 = arith.constant 0 : i32
    %c0_i32_0 = arith.constant 0 : i32
    return %arg0, %c0_i32 : i32, i32
  }
  func.func @transform_1(%arg0: i32) -> (i32, i32) {
    %c0_i32 = arith.constant 0 : i32
    %c0_i32_0 = arith.constant 0 : i32
    return %arg0, %c0_i32 : i32, i32
  }
  func.func @transform_2(%arg0: i32) -> (i32, i32) {
    %c0_i32 = arith.constant 0 : i32
    %c0_i32_0 = arith.constant 0 : i32
    return %arg0, %c0_i32 : i32, i32
  }
}

</mosaic_0001>

<bundles_post_ra>
// kernel: tpu_custom_call.1
= control target key start
LH: loop header
LB: loop body
LE: loop exit
PB: predicated region body
PF: predicated region fallthrough
CT: control target
= control target key end

     0   :  { %7 = vsyncpa [#allocation3], 0  ;;  %s323_s0 = inlined_call_operand.hbm [shape: f32[256,128], index: 0, kind: input, shape index: {}]   ;;  %s324_s1 = inlined_call_operand.hbm [shape: f32[256,128], index: 1, kind: input, shape index: {}]   ;;  %s325_s2 = inlined_call_operand.hbm [shape: f32[256,256], index: 2, kind: output, shape index: {}]  }
   0x1   :  { %8 = vsyncpa [#allocation6], 0 }
   0x2   :  { %9 = vsyncpa [#allocation4], 0  ;;  %s265_s9 = smov [#allocation2]   ;;  %s193_s13 = scalar_lea.hbm %s323_s0, 4096 }
   0x3   :  { %s15_s10 = sshll.u32 %s265_s9, 4  ;;  %p194_p0 = scmp.ne.s32.totalorder %s323_s0, %s193_s13  ;;  %s16_s10 = int_to_ptr.vmem [resolvable:$true] %s15_s10 }
   0x4   :  { %p197_p1 = scmp.lt.u32.totalorder %s193_s13, %s323_s0 }
   0x6   :  { %p199_p2 = pnand %p197_p1, %p194_p0 }
   0x8   :  { %202 = shalt.err (!%p199_p2)
}
   0x9   :  { %s203_s18 = scalar_lea.vmem %s16_s10, 4096  ;;  %p208_p4 = scmp.lt.s32.totalorder %s16_s10, %s16_s10 }
   0xa   :  { %p204_p3 = scmp.ne.s32.totalorder %s16_s10, %s203_s18  ;;  %p209_p5 = scmp.lt.s32.totalorder %s203_s18, %s203_s18 }
   0xc   :  { %p210_p6 = por %p209_p5, %p208_p4 }
   0xe   :  { %p211_p7 = pnand %p210_p6, %p204_p3 }
  0x10   :  { %214 = shalt.err (!%p211_p7)
}
  0x11   :  { %s266_s19 = smov 128   ;;  %s267_s20 = smov 8  }
  0x12   :  { %21 = dma.hbm_to_vmem [thread:$0]  %s323_s0, 4096, %s16_s10, [#allocation3], %s266_s19, %s266_s19, %s267_s20  }
  0x13   :  { %s268_s23 = smov [#allocation5]   ;;  %s215_s27 = scalar_lea.hbm %s324_s1, 4096 }
  0x14   :  { %s27_s24 = sshll.u32 %s268_s23, 4  ;;  %p216_p8 = scmp.ne.s32.totalorder %s324_s1, %s215_s27  ;;  %s28_s24 = int_to_ptr.vmem [resolvable:$true] %s27_s24 }
  0x15   :  { %p219_p9 = scmp.lt.u32.totalorder %s215_s27, %s324_s1 }
  0x17   :  { %p221_p10 = pnand %p219_p9, %p216_p8 }
  0x19   :  { %224 = shalt.err (!%p221_p10)
}
  0x1a   :  { %s225_s4 = scalar_lea.vmem %s28_s24, 4096  ;;  %p230_p12 = scmp.lt.s32.totalorder %s28_s24, %s28_s24 }
  0x1b   :  { %p226_p11 = scmp.ne.s32.totalorder %s28_s24, %s225_s4  ;;  %p231_p13 = scmp.lt.s32.totalorder %s225_s4, %s225_s4 }
  0x1d   :  { %p232_p0 = por %p231_p13, %p230_p12 }
  0x1f   :  { %p233_p1 = pnand %p232_p0, %p226_p11 }
  0x21   :  { %236 = shalt.err (!%p233_p1)
}
  0x22   :  { %33 = dma.hbm_to_vmem [thread:$0]  %s324_s1, 4096, %s28_s24, [#allocation6], %s266_s19, %s266_s19, %s267_s20  }
  0x23   :  { %259 = dma.done.wait [#allocation3], 4096  }
  0x24   :  { %260 = vsyncadd [#allocation3], 4294963200 }
  0x25   :  { %261 = dma.done.wait [#allocation6], 4096  }
  0x26   :  { %262 = vsyncadd [#allocation6], 4294963200  ;;  %v40_v0 = vld [vmem:[#allocation2] sm:$0xff]  ;;  %v41_v1 = vld [vmem:[#allocation2 + $0x8] sm:$0xff]  ;;  %s269_s1 = smov [#allocation7]  }
  0x27   :  { %v42_v2 = vld [vmem:[#allocation2 + $0x10] sm:$0xff]  ;;  %72 = vst [vmem:[#allocation7] sm:$0xff] %v40_v0  ;;  %73 = vst [vmem:[#allocation7 + $0x10] sm:$0xff] %v41_v1  ;;  %v43_v3 = vld [vmem:[#allocation2 + $0x18] sm:$0xff]  ;;  %s173_s6 = sshll.u32 %s269_s1, 4  ;;  %s174_s6 = int_to_ptr.vmem [resolvable:$true] %s173_s6 }
  0x28   :  { %74 = vst [vmem:[#allocation7 + $0x20] sm:$0xff] %v42_v2  ;;  %v44_v4 = vld [vmem:[#allocation2 + $0x20] sm:$0xff]  ;;  %v45_v5 = vld [vmem:[#allocation2 + $0x28] sm:$0xff]  ;;  %75 = vst [vmem:[#allocation7 + $0x30] sm:$0xff] %v43_v3  ;;  %s237_s7 = scalar_lea.vmem %s174_s6, 8192  ;;  %p242_p3 = scmp.lt.s32.totalorder %s174_s6, %s174_s6 }
  0x29   :  { %76 = vst [vmem:[#allocation7 + $0x40] sm:$0xff] %v44_v4  ;;  %77 = vst [vmem:[#allocation7 + $0x50] sm:$0xff] %v45_v5  ;;  %v46_v6 = vld [vmem:[#allocation2 + $0x30] sm:$0xff]  ;;  %v47_v7 = vld [vmem:[#allocation2 + $0x38] sm:$0xff]  ;;  %p238_p2 = scmp.ne.s32.totalorder %s174_s6, %s237_s7  ;;  %p243_p4 = scmp.lt.s32.totalorder %s237_s7, %s237_s7 }
  0x2a   :  { %v48_v8 = vld [vmem:[#allocation2 + $0x40] sm:$0xff]  ;;  %78 = vst [vmem:[#allocation7 + $0x60] sm:$0xff] %v46_v6  ;;  %79 = vst [vmem:[#allocation7 + $0x70] sm:$0xff] %v47_v7  ;;  %v49_v9 = vld [vmem:[#allocation2 + $0x48] sm:$0xff] }
  0x2b   :  { %80 = vst [vmem:[#allocation7 + $0x80] sm:$0xff] %v48_v8  ;;  %v50_v10 = vld [vmem:[#allocation2 + $0x50] sm:$0xff]  ;;  %v51_v11 = vld [vmem:[#allocation2 + $0x58] sm:$0xff]  ;;  %81 = vst [vmem:[#allocation7 + $0x90] sm:$0xff] %v49_v9  ;;  %p244_p5 = por %p243_p4, %p242_p3 }
  0x2c   :  { %82 = vst [vmem:[#allocation7 + $0xa0] sm:$0xff] %v50_v10  ;;  %83 = vst [vmem:[#allocation7 + $0xb0] sm:$0xff] %v51_v11  ;;  %v52_v12 = vld [vmem:[#allocation2 + $0x60] sm:$0xff]  ;;  %v53_v13 = vld [vmem:[#allocation2 + $0x68] sm:$0xff] }
  0x2d   :  { %v54_v14 = vld [vmem:[#allocation2 + $0x70] sm:$0xff]  ;;  %84 = vst [vmem:[#allocation7 + $0xc0] sm:$0xff] %v52_v12  ;;  %85 = vst [vmem:[#allocation7 + $0xd0] sm:$0xff] %v53_v13  ;;  %v55_v15 = vld [vmem:[#allocation2 + $0x78] sm:$0xff]  ;;  %p245_p6 = pnand %p244_p5, %p238_p2 }
  0x2e   :  { %86 = vst [vmem:[#allocation7 + $0xe0] sm:$0xff] %v54_v14  ;;  %v56_v16 = vld [vmem:[#allocation2 + $0x80] sm:$0xff]  ;;  %v57_v17 = vld [vmem:[#allocation2 + $0x88] sm:$0xff]  ;;  %87 = vst [vmem:[#allocation7 + $0xf0] sm:$0xff] %v55_v15 }
  0x2f   :  { %88 = vst [vmem:[#allocation7 + $0x100] sm:$0xff] %v56_v16  ;;  %89 = vst [vmem:[#allocation7 + $0x110] sm:$0xff] %v57_v17  ;;  %v58_v18 = vld [vmem:[#allocation2 + $0x90] sm:$0xff]  ;;  %v59_v19 = vld [vmem:[#allocation2 + $0x98] sm:$0xff] }
  0x30   :  { %v60_v20 = vld [vmem:[#allocation2 + $0xa0] sm:$0xff]  ;;  %90 = vst [vmem:[#allocation7 + $0x120] sm:$0xff] %v58_v18  ;;  %91 = vst [vmem:[#allocation7 + $0x130] sm:$0xff] %v59_v19  ;;  %v61_v21 = vld [vmem:[#allocation2 + $0xa8] sm:$0xff] }
  0x31   :  { %92 = vst [vmem:[#allocation7 + $0x140] sm:$0xff] %v60_v20  ;;  %v62_v22 = vld [vmem:[#allocation2 + $0xb0] sm:$0xff]  ;;  %v63_v23 = vld [vmem:[#allocation2 + $0xb8] sm:$0xff]  ;;  %93 = vst [vmem:[#allocation7 + $0x150] sm:$0xff] %v61_v21 }
  0x32   :  { %94 = vst [vmem:[#allocation7 + $0x160] sm:$0xff] %v62_v22  ;;  %95 = vst [vmem:[#allocation7 + $0x170] sm:$0xff] %v63_v23  ;;  %v64_v24 = vld [vmem:[#allocation2 + $0xc0] sm:$0xff]  ;;  %v65_v25 = vld [vmem:[#allocation2 + $0xc8] sm:$0xff] }
  0x33   :  { %v66_v26 = vld [vmem:[#allocation2 + $0xd0] sm:$0xff]  ;;  %96 = vst [vmem:[#allocation7 + $0x180] sm:$0xff] %v64_v24  ;;  %97 = vst [vmem:[#allocation7 + $0x190] sm:$0xff] %v65_v25  ;;  %v67_v27 = vld [vmem:[#allocation2 + $0xd8] sm:$0xff] }
  0x34   :  { %98 = vst [vmem:[#allocation7 + $0x1a0] sm:$0xff] %v66_v26  ;;  %v68_v28 = vld [vmem:[#allocation2 + $0xe0] sm:$0xff]  ;;  %v69_v29 = vld [vmem:[#allocation2 + $0xe8] sm:$0xff]  ;;  %99 = vst [vmem:[#allocation7 + $0x1b0] sm:$0xff] %v67_v27 }
  0x35   :  { %100 = vst [vmem:[#allocation7 + $0x1c0] sm:$0xff] %v68_v28  ;;  %101 = vst [vmem:[#allocation7 + $0x1d0] sm:$0xff] %v69_v29  ;;  %v70_v30 = vld [vmem:[#allocation2 + $0xf0] sm:$0xff]  ;;  %v71_v31 = vld [vmem:[#allocation2 + $0xf8] sm:$0xff] }
  0x36   :  { %v104_v32 = vld [vmem:[#allocation5] sm:$0xff]  ;;  %102 = vst [vmem:[#allocation7 + $0x1e0] sm:$0xff] %v70_v30  ;;  %103 = vst [vmem:[#allocation7 + $0x1f0] sm:$0xff] %v71_v31  ;;  %v105_v33 = vld [vmem:[#allocation5 + $0x8] sm:$0xff] }
  0x37   :  { %136 = vst [vmem:[#allocation7 + $0x8] sm:$0xff] %v104_v32  ;;  %v106_v34 = vld [vmem:[#allocation5 + $0x10] sm:$0xff]  ;;  %v107_v35 = vld [vmem:[#allocation5 + $0x18] sm:$0xff]  ;;  %137 = vst [vmem:[#allocation7 + $0x18] sm:$0xff] %v105_v33 }
  0x38   :  { %138 = vst [vmem:[#allocation7 + $0x28] sm:$0xff] %v106_v34  ;;  %139 = vst [vmem:[#allocation7 + $0x38] sm:$0xff] %v107_v35  ;;  %v108_v36 = vld [vmem:[#allocation5 + $0x20] sm:$0xff]  ;;  %v109_v37 = vld [vmem:[#allocation5 + $0x28] sm:$0xff] }
  0x39   :  { %v110_v38 = vld [vmem:[#allocation5 + $0x30] sm:$0xff]  ;;  %140 = vst [vmem:[#allocation7 + $0x48] sm:$0xff] %v108_v36  ;;  %141 = vst [vmem:[#allocation7 + $0x58] sm:$0xff] %v109_v37  ;;  %v111_v39 = vld [vmem:[#allocation5 + $0x38] sm:$0xff] }
  0x3a   :  { %142 = vst [vmem:[#allocation7 + $0x68] sm:$0xff] %v110_v38  ;;  %v112_v40 = vld [vmem:[#allocation5 + $0x40] sm:$0xff]  ;;  %v113_v41 = vld [vmem:[#allocation5 + $0x48] sm:$0xff]  ;;  %143 = vst [vmem:[#allocation7 + $0x78] sm:$0xff] %v111_v39 }
  0x3b   :  { %144 = vst [vmem:[#allocation7 + $0x88] sm:$0xff] %v112_v40  ;;  %145 = vst [vmem:[#allocation7 + $0x98] sm:$0xff] %v113_v41  ;;  %v114_v42 = vld [vmem:[#allocation5 + $0x50] sm:$0xff]  ;;  %v115_v43 = vld [vmem:[#allocation5 + $0x58] sm:$0xff] }
  0x3c   :  { %v116_v44 = vld [vmem:[#allocation5 + $0x60] sm:$0xff]  ;;  %146 = vst [vmem:[#allocation7 + $0xa8] sm:$0xff] %v114_v42  ;;  %147 = vst [vmem:[#allocation7 + $0xb8] sm:$0xff] %v115_v43  ;;  %v117_v45 = vld [vmem:[#allocation5 + $0x68] sm:$0xff] }
  0x3d   :  { %148 = vst [vmem:[#allocation7 + $0xc8] sm:$0xff] %v116_v44  ;;  %v118_v46 = vld [vmem:[#allocation5 + $0x70] sm:$0xff]  ;;  %v119_v47 = vld [vmem:[#allocation5 + $0x78] sm:$0xff]  ;;  %149 = vst [vmem:[#allocation7 + $0xd8] sm:$0xff] %v117_v45 }
  0x3e   :  { %150 = vst [vmem:[#allocation7 + $0xe8] sm:$0xff] %v118_v46  ;;  %151 = vst [vmem:[#allocation7 + $0xf8] sm:$0xff] %v119_v47  ;;  %v120_v48 = vld [vmem:[#allocation5 + $0x80] sm:$0xff]  ;;  %v121_v49 = vld [vmem:[#allocation5 + $0x88] sm:$0xff] }
  0x3f   :  { %v122_v50 = vld [vmem:[#allocation5 + $0x90] sm:$0xff]  ;;  %152 = vst [vmem:[#allocation7 + $0x108] sm:$0xff] %v120_v48  ;;  %153 = vst [vmem:[#allocation7 + $0x118] sm:$0xff] %v121_v49  ;;  %v123_v51 = vld [vmem:[#allocation5 + $0x98] sm:$0xff] }
  0x40   :  { %154 = vst [vmem:[#allocation7 + $0x128] sm:$0xff] %v122_v50  ;;  %v124_v52 = vld [vmem:[#allocation5 + $0xa0] sm:$0xff]  ;;  %v125_v53 = vld [vmem:[#allocation5 + $0xa8] sm:$0xff]  ;;  %155 = vst [vmem:[#allocation7 + $0x138] sm:$0xff] %v123_v51 }
  0x41   :  { %156 = vst [vmem:[#allocation7 + $0x148] sm:$0xff] %v124_v52  ;;  %157 = vst [vmem:[#allocation7 + $0x158] sm:$0xff] %v125_v53  ;;  %v126_v54 = vld [vmem:[#allocation5 + $0xb0] sm:$0xff]  ;;  %v127_v55 = vld [vmem:[#allocation5 + $0xb8] sm:$0xff] }
  0x42   :  { %v128_v56 = vld [vmem:[#allocation5 + $0xc0] sm:$0xff]  ;;  %158 = vst [vmem:[#allocation7 + $0x168] sm:$0xff] %v126_v54  ;;  %159 = vst [vmem:[#allocation7 + $0x178] sm:$0xff] %v127_v55  ;;  %v129_v57 = vld [vmem:[#allocation5 + $0xc8] sm:$0xff] }
  0x43   :  { %160 = vst [vmem:[#allocation7 + $0x188] sm:$0xff] %v128_v56  ;;  %v130_v58 = vld [vmem:[#allocation5 + $0xd0] sm:$0xff]  ;;  %v131_v59 = vld [vmem:[#allocation5 + $0xd8] sm:$0xff]  ;;  %161 = vst [vmem:[#allocation7 + $0x198] sm:$0xff] %v129_v57 }
  0x44   :  { %162 = vst [vmem:[#allocation7 + $0x1a8] sm:$0xff] %v130_v58  ;;  %163 = vst [vmem:[#allocation7 + $0x1b8] sm:$0xff] %v131_v59  ;;  %v132_v60 = vld [vmem:[#allocation5 + $0xe0] sm:$0xff]  ;;  %v133_v61 = vld [vmem:[#allocation5 + $0xe8] sm:$0xff] }
  0x45   :  { %v134_v62 = vld [vmem:[#allocation5 + $0xf0] sm:$0xff]  ;;  %164 = vst [vmem:[#allocation7 + $0x1c8] sm:$0xff] %v132_v60  ;;  %165 = vst [vmem:[#allocation7 + $0x1d8] sm:$0xff] %v133_v61  ;;  %v135_v63 = vld [vmem:[#allocation5 + $0xf8] sm:$0xff] }
  0x46   :  { %166 = vst [vmem:[#allocation7 + $0x1e8] sm:$0xff] %v134_v62  ;;  %167 = vst [vmem:[#allocation7 + $0x1f8] sm:$0xff] %v135_v63 }
  0x47   :  { %248 = shalt.err (!%p245_p6)
}
  0x48   :  { %s249_s10 = scalar_lea.hbm %s325_s2, 8192 }
  0x49   :  { %p250_p7 = scmp.ne.s32.totalorder %s325_s2, %s249_s10  ;;  %p253_p8 = scmp.lt.u32.totalorder %s249_s10, %s325_s2 }
  0x4b   :  { %p255_p9 = pnand %p253_p8, %p250_p7 }
  0x4d   :  { %258 = shalt.err (!%p255_p9)
}
  0x4e   :  { %s270_s15 = smov 256   ;;  %s271_s16 = smov 16  }
  0x4f   :  { %179 = dma.vmem_to_hbm [thread:$0]  %s174_s6, 8192, %s325_s2, [#allocation4], %s270_s15, %s270_s15, %s271_s16  }
  0x50   :  { %263 = dma.done.wait [#allocation4], 8192  }
  0x51   :  { %264 = vsyncadd [#allocation4], 4294959104 }
  0x52   :  { %183 = vsyncpa [#allocation3], 1 }
  0x53   :  { %184 = vsyncpa [#allocation6], 1 }
  0x54   :  { %185 = vsyncpa [#allocation4], 1 }

</bundles_post_ra>
